<compile_context>
chip_gen: v7x
topology: tpu7x:2x2x1
jax: 0.10.0
libtpu: 0.0.40
codegen_flags: <defaults>
</compile_context>

<pallas_src>
import functools

import jax
import jax.numpy as jnp
from jax.experimental import pallas as pl
from jax.experimental.pallas import tpu as pltpu


def _round_up(x, m):
    return ((x + m - 1) // m) * m


def _matmul_kernel(a_ref, b_ref, bias_ref, o_ref, *, fuse_relu):
    """One (tm, tn) output tile of  maybe_relu(A @ B + bias), accumulated over k.

    a_ref:    (tm, tk) bf16 tile of A
    b_ref:    (tk, tn) bf16 tile of B
    bias_ref: (1,  tn) f32 bias slice (zeros when the layer has no bias)
    o_ref:    (tm, tn) f32 output tile -- doubles as the accumulator; it stays
              resident across the k grid axis, so no VMEM scratch is needed.
    """
    k = pl.program_id(2)

    @pl.when(k == 0)
    def _():
        o_ref[...] = jnp.zeros_like(o_ref)

    # bf16 x bf16 -> f32 on the MXU; elementwise work is kept out of this body.
    o_ref[...] += jnp.dot(a_ref[...], b_ref[...],
                          preferred_element_type=jnp.float32)

    @pl.when(k == pl.num_programs(2) - 1)
    def _():
        out = o_ref[...] + bias_ref[...]
        if fuse_relu:
            out = jnp.maximum(out, 0.0)
        o_ref[...] = out


@functools.partial(jax.jit, static_argnames=("fuse_relu", "tm", "tn", "tk"))
def matmul_bias_act(a, b, bias=None, *, fuse_relu=False, tm=512, tn=512, tk=512):
    """f32 out = maybe_relu(a @ b + bias), bf16 MXU inputs, f32 accumulation."""
    M, K = a.shape
    K2, N = b.shape
    assert K == K2, "inner dimensions must match"

    # Clamp tiles to the lane-aligned problem; tiles stay multiples of 128.
    tm = min(tm, _round_up(M, 128))
    tn = min(tn, _round_up(N, 128))
    tk = min(tk, _round_up(K, 128))
    Mp, Np, Kp = _round_up(M, tm), _round_up(N, tn), _round_up(K, tk)

    # bf16 inputs halve HBM traffic for the dominant (N x N) adjacency operand
    # and feed the MXU at its native rate; zero padding keeps the math exact.
    a_p = jnp.pad(a.astype(jnp.bfloat16), ((0, Mp - M), (0, Kp - K)))
    b_p = jnp.pad(b.astype(jnp.bfloat16), ((0, Kp - K), (0, Np - N)))
    if bias is None:
        bias_p = jnp.zeros((1, Np), jnp.float32)
    else:
        bias_p = jnp.pad(bias.astype(jnp.float32).reshape(1, N),
                         ((0, 0), (0, Np - N)))

    grid = (Mp // tm, Np // tn, Kp // tk)
    out_p = pl.pallas_call(
        functools.partial(_matmul_kernel, fuse_relu=fuse_relu),
        out_shape=jax.ShapeDtypeStruct((Mp, Np), jnp.float32),
        grid_spec=pltpu.PrefetchScalarGridSpec(
            num_scalar_prefetch=0,
            grid=grid,
            in_specs=[
                pl.BlockSpec((tm, tk), lambda i, j, k: (i, k)),   # A tile
                pl.BlockSpec((tk, tn), lambda i, j, k: (k, j)),   # B tile
                pl.BlockSpec((1, tn), lambda i, j, k: (0, j)),    # bias slice
            ],
            out_specs=pl.BlockSpec((tm, tn), lambda i, j, k: (i, j)),
        ),
        compiler_params=pltpu.CompilerParams(
            dimension_semantics=("parallel", "parallel", "arbitrary"),
            vmem_limit_bytes=48 * 1024 * 1024,   # headroom under v7x's 64 MiB
        ),
    )(a_p, b_p, bias_p)
    return out_p[:M, :N]


def gcn_forward(x, A, weights, biases, *, tm=512, tn=512, tk=512):
    """Inference forward of GCN (residual=False, bn=False, dense adjacency).

    weights[l]: (out_l, in_l) torch-layout nn.Linear weight of layer l
    biases[l]:  (out_l,) nn.Linear bias of layer l (or None)
    """
    num_layers = len(weights)
    # Cast the adjacency to bf16 once; it is reused by every layer.
    A_bf16 = A.astype(jnp.bfloat16)
    h = x
    # TODO(synk): dropout / dropout_adj are training-only (identity in eval) and
    # the sparse / bn / residual / prompts / log_softmax branches (off by
    # default) are not implemented.
    for l in range(num_layers):
        # hidden = h @ W^T + b   (nn.Linear inside GCNConv; bias fused in epilogue)
        hidden = matmul_bias_act(h, weights[l].T, biases[l],
                                 fuse_relu=False, tm=tm, tn=tn, tk=tk)
        # out = A @ hidden, ReLU fused for every layer except the last.
        h = matmul_bias_act(A_bf16, hidden, None,
                            fuse_relu=(l < num_layers - 1),
                            tm=tm, tn=tn, tk=tk)
    return h


if __name__ == "__main__":
    # Small 2-layer GCN; shapes deliberately NOT multiples of 128 to exercise
    # the padding path requested in the review.
    N = 200
    in_channels = 96
    hidden_channels = 160
    out_channels = 48

    key = jax.random.PRNGKey(0)
    kx, ka, kw1, kb1, kw2, kb2 = jax.random.split(key, 6)

    x = jax.random.normal(kx, (N, in_channels), dtype=jnp.float32)

    # Dense row-normalized adjacency.
    A_raw = jax.random.uniform(ka, (N, N), dtype=jnp.float32)
    A = A_raw / jnp.sum(A_raw, axis=-1, keepdims=True)

    # nn.Linear-style init: U(-1/sqrt(fan_in), 1/sqrt(fan_in)).
    def lin_init(kw, kb, fan_out, fan_in):
        bound = 1.0 / float(fan_in) ** 0.5
        W = jax.random.uniform(kw, (fan_out, fan_in), jnp.float32, -bound, bound)
        b = jax.random.uniform(kb, (fan_out,), jnp.float32, -bound, bound)
        return W, b

    W1, b1 = lin_init(kw1, kb1, hidden_channels, in_channels)
    W2, b2 = lin_init(kw2, kb2, out_channels, hidden_channels)

    out = gcn_forward(x, A, [W1, W2], [b1, b2])
    out = jax.block_until_ready(out)
    assert out.shape == (N, out_channels)

    # Reference 1: identical bf16-input / f32-accumulate math in plain JAX
    # (validates the kernel itself; only accumulation order differs).
    def mm_bf16(a, b):
        return jnp.dot(a.astype(jnp.bfloat16), b.astype(jnp.bfloat16),
                       preferred_element_type=jnp.float32)

    h_ref = jnp.maximum(mm_bf16(A, mm_bf16(x, W1.T) + b1), 0.0)
    ref_bf16 = mm_bf16(A, mm_bf16(h_ref, W2.T) + b2)
    assert jnp.allclose(out, ref_bf16, atol=1e-2, rtol=1e-2), \
        "mismatch vs bf16-path reference"

    # Reference 2: full f32 semantics of the PyTorch module (looser, relative
    # to the output scale, because the kernel feeds bf16 to the MXU).
    h_f32 = jnp.maximum(A @ (x @ W1.T + b1), 0.0)
    ref_f32 = A @ (h_f32 @ W2.T + b2)
    rel_err = jnp.max(jnp.abs(out - ref_f32)) / (jnp.max(jnp.abs(ref_f32)) + 1e-6)
    assert rel_err < 5e-2, f"semantic mismatch vs f32 reference (rel_err={rel_err})"

    print("KERNEL_OK")
</pallas_src>

<mosaic_0001>
module attributes {stable_mosaic.version = 11 : i64} {
  func.func @_matmul_kernel(%arg0: i32, %arg1: i32, %arg2: i32, %arg3: memref<256x128xbf16, #tpu.memory_space<vmem>>, %arg4: memref<128x256xbf16, #tpu.memory_space<vmem>>, %arg5: memref<1x256xf32, #tpu.memory_space<vmem>>, %arg6: memref<256x256xf32, #tpu.memory_space<vmem>>) attributes {dimension_semantics = [#tpu.dimension_semantics<parallel>, #tpu.dimension_semantics<parallel>, #tpu.dimension_semantics<arbitrary>], iteration_bounds = array<i64: 1, 1, 1>, scalar_prefetch = 0 : i64, scratch_operands = 0 : i64, tpu.core_type = #tpu.core_type<tc>, window_params = [{transform_indices = @transform_0, window_bounds = array<i64: 256, 128>}, {transform_indices = @transform_1, window_bounds = array<i64: 128, 256>}, {transform_indices = @transform_2, window_bounds = array<i64: 1, 256>}, {transform_indices = @transform_3, window_bounds = array<i64: 256, 256>}]} {
    %c0_i32 = arith.constant 0 : i32
    %0 = arith.cmpi eq, %arg2, %c0_i32 : i32
    %1 = arith.extui %0 : i1 to i32
    %c0_i32_0 = arith.constant 0 : i32
    %2 = arith.cmpi ne, %1, %c0_i32_0 : i32
    scf.if %2 {
      %cst_10 = arith.constant 0.000000e+00 : f32
      %12 = vector.broadcast %cst_10 : f32 to vector<256x256xf32>
      %c0_11 = arith.constant 0 : index
      %c0_12 = arith.constant 0 : index
      %13 = vector.load %arg6[%c0_11, %c0_12] : memref<256x256xf32, #tpu.memory_space<vmem>>, vector<256x256xf32>
      tpu.vector_store %arg6[%c0_11, %c0_12], %12 {strides = array<i32>} : memref<256x256xf32, #tpu.memory_space<vmem>>, vector<256x256xf32>,
    } else {
    }
    %c0 = arith.constant 0 : index
    %c0_1 = arith.constant 0 : index
    %3 = vector.load %arg6[%c0, %c0_1] : memref<256x256xf32, #tpu.memory_space<vmem>>, vector<256x256xf32>
    %c0_2 = arith.constant 0 : index
    %c0_3 = arith.constant 0 : index
    %4 = vector.load %arg3[%c0_2, %c0_3] : memref<256x128xbf16, #tpu.memory_space<vmem>>, vector<256x128xbf16>
    %c0_4 = arith.constant 0 : index
    %c0_5 = arith.constant 0 : index
    %5 = vector.load %arg4[%c0_4, %c0_5] : memref<128x256xbf16, #tpu.memory_space<vmem>>, vector<128x256xbf16>
    %cst = arith.constant dense<0.000000e+00> : vector<256x256xf32>
    %6 = tpu.matmul %4, %5, %cst {dimension_numbers = #tpu.dot_dimension_numbers<[1], [0], [0], [1], [0, 0, 1, 1], [], []>} : vector<256x128xbf16>, vector<128x256xbf16>, vector<256x256xf32> -> vector<256x256xf32>
    %7 = arith.addf %3, %6 : vector<256x256xf32>
    %c0_6 = arith.constant 0 : index
    %c0_7 = arith.constant 0 : index
    %8 = vector.load %arg6[%c0_6, %c0_7] : memref<256x256xf32, #tpu.memory_space<vmem>>, vector<256x256xf32>
    tpu.vector_store %arg6[%c0_6, %c0_7], %7 {strides = array<i32>} : memref<256x256xf32, #tpu.memory_space<vmem>>, vector<256x256xf32>,
    %c0_i32_8 = arith.constant 0 : i32
    %9 = arith.cmpi eq, %arg2, %c0_i32_8 : i32
    %10 = arith.extui %9 : i1 to i32
    %c0_i32_9 = arith.constant 0 : i32
    %11 = arith.cmpi ne, %10, %c0_i32_9 : i32
    scf.if %11 {
      %c0_10 = arith.constant 0 : index
      %c0_11 = arith.constant 0 : index
      %12 = vector.load %arg6[%c0_10, %c0_11] : memref<256x256xf32, #tpu.memory_space<vmem>>, vector<256x256xf32>
      %c0_12 = arith.constant 0 : index
      %c0_13 = arith.constant 0 : index
      %13 = vector.load %arg5[%c0_12, %c0_13] : memref<1x256xf32, #tpu.memory_space<vmem>>, vector<1x256xf32>
      %14 = vector.broadcast %13 : vector<1x256xf32> to vector<256x256xf32>
      %15 = arith.addf %12, %14 : vector<256x256xf32>
      %c0_14 = arith.constant 0 : index
      %c0_15 = arith.constant 0 : index
      %16 = vector.load %arg6[%c0_14, %c0_15] : memref<256x256xf32, #tpu.memory_space<vmem>>, vector<256x256xf32>
      tpu.vector_store %arg6[%c0_14, %c0_15], %15 {strides = array<i32>} : memref<256x256xf32, #tpu.memory_space<vmem>>, vector<256x256xf32>,
    } else {
    }
    return
  }
  func.func @transform_0(%arg0: i32, %arg1: i32, %arg2: i32) -> (i32, i32) {
    %c0_i32 = arith.constant 0 : i32
    return %arg0, %arg2 : i32, i32
  }
  func.func @transform_1(%arg0: i32, %arg1: i32, %arg2: i32) -> (i32, i32) {
    %c0_i32 = arith.constant 0 : i32
    return %arg2, %arg1 : i32, i32
  }
  func.func @transform_2(%arg0: i32, %arg1: i32, %arg2: i32) -> (i32, i32) {
    %c0_i32 = arith.constant 0 : i32
    %c0_i32_0 = arith.constant 0 : i32
    return %c0_i32, %arg1 : i32, i32
  }
  func.func @transform_3(%arg0: i32, %arg1: i32, %arg2: i32) -> (i32, i32) {
    %c0_i32 = arith.constant 0 : i32
    return %arg0, %arg1 : i32, i32
  }
}

</mosaic_0001>

<bundles_post_ra>
// kernel: matmul_bias_act.1
= control target key start
LH: loop header
LB: loop body
LE: loop exit
PB: predicated region body
PF: predicated region fallthrough
CT: control target
= control target key end

     0   :  { %v993_v1 = vmov 0   ;;  %v761_v33 = vlaneseq  ;;  %s1389_s1 = inlined_call_operand.vmem [shape: bf16[128,256], index: 1, kind: input, shape index: {}]   ;;  %s1390_s0 = inlined_call_operand.vmem [shape: bf16[256,128], index: 0, kind: input, shape index: {}]   ;;  %s1391_s2 = inlined_call_operand.vmem [shape: f32[1,256], index: 2, kind: input, shape index: {}]   ;;  %s1392_s3 = inlined_call_operand.vmem [shape: f32[256,256], index: 3, kind: output, shape index: {}]  }
   0x1   :  { %v953_v0 = vld [vmem:[%s1389_s1 + $0x4] ss:$8 sps:$4 sm:$0xff]   ;;  %403 = vmatprep.mubr.bf16.mxu0 %v993_v1  ;;  %483 = vmatprep.mubr.bf16.mxu1 %v993_v1  ;;  %v955_v2 = vld [vmem:[%s1389_s1] ss:$8 sps:$4 sm:$0xff]   ;;  %v956_v3 = vld [vmem:[%s1389_s1 + $0x14] ss:$8 sps:$4 sm:$0xff]  }
   0x2   :  { %371 = vmatprep.subr.bf16.mxu0 %v953_v0  ;;  %935 = vmatprep.subr.bf16.mxu1 %v953_v0  ;;  %v958_v4 = vld [vmem:[%s1389_s1 + $0x10] ss:$8 sps:$4 sm:$0xff]   ;;  %v959_v5 = vld [vmem:[%s1389_s1 + $0x24] ss:$8 sps:$4 sm:$0xff]   ;;  %v961_v6 = vld [vmem:[%s1389_s1 + $0x20] ss:$8 sps:$4 sm:$0xff]  }
   0x3   :  { %372 = vmatpush1.bf16.msra.mxu0 %v955_v2  ;;  %943 = vmatpush1.bf16.msra.mxu1 %v955_v2  ;;  %v962_v7 = vld [vmem:[%s1389_s1 + $0x34] ss:$8 sps:$4 sm:$0xff]   ;;  %v964_v8 = vld [vmem:[%s1389_s1 + $0x30] ss:$8 sps:$4 sm:$0xff]   ;;  %v965_v9 = vld [vmem:[%s1389_s1 + $0x44] ss:$8 sps:$4 sm:$0xff]  }
   0x4   :  { %373 = vmatprep.subr.bf16.mxu0 %v956_v3  ;;  %936 = vmatprep.subr.bf16.mxu1 %v956_v3  ;;  %v967_v10 = vld [vmem:[%s1389_s1 + $0x40] ss:$8 sps:$4 sm:$0xff]   ;;  %v968_v11 = vld [vmem:[%s1389_s1 + $0x54] ss:$8 sps:$4 sm:$0xff]   ;;  %v970_v12 = vld [vmem:[%s1389_s1 + $0x50] ss:$8 sps:$4 sm:$0xff]  }
   0x5   :  { %v971_v13 = vld [vmem:[%s1389_s1 + $0x64] ss:$8 sps:$4 sm:$0xff]   ;;  %v973_v14 = vld [vmem:[%s1389_s1 + $0x60] ss:$8 sps:$4 sm:$0xff]   ;;  %v974_v15 = vld [vmem:[%s1389_s1 + $0x74] ss:$8 sps:$4 sm:$0xff]  }
   0x6   :  { %v976_v16 = vld [vmem:[%s1389_s1 + $0x70] ss:$8 sps:$4 sm:$0xff]   ;;  %v977_v17 = vld [vmem:[%s1390_s0] sm:$0xff]   ;;  %v979_v19 = vld [vmem:[%s1390_s0 + $0x8] sm:$0xff]   ;;  %v762_v34 = vshrl.u32 %v761_v33, 7 }
   0x7   :  { %374 = vmatpush1.bf16.msra.mxu0 %v958_v4  ;;  %944 = vmatpush1.bf16.msra.mxu1 %v958_v4  ;;  %v978_v18 = vld [vmem:[%s1390_s0 + $0x40] sm:$0xff]   ;;  %v980_v20 = vld [vmem:[%s1390_s0 + $0x48] sm:$0xff]   ;;  %v981_v21 = vld [vmem:[%s1390_s0 + $0x10] sm:$0xff]  }
   0x8   :  { %375 = vmatprep.subr.bf16.mxu0 %v959_v5  ;;  %937 = vmatprep.subr.bf16.mxu1 %v959_v5  ;;  %v982_v22 = vld [vmem:[%s1390_s0 + $0x50] sm:$0xff]   ;;  %v983_v23 = vld [vmem:[%s1390_s0 + $0x18] sm:$0xff]   ;;  %v985_v25 = vld [vmem:[%s1390_s0 + $0x20] sm:$0xff]   ;;  %v763_v35 = vsub.s32 0, %v762_v34  ;;  %v767_v37 = vsub.s32 1, %v762_v34 }
   0x9   :  { %v984_v24 = vld [vmem:[%s1390_s0 + $0x58] sm:$0xff]   ;;  %v986_v26 = vld [vmem:[%s1390_s0 + $0x60] sm:$0xff]   ;;  %v987_v27 = vld [vmem:[%s1390_s0 + $0x28] sm:$0xff]  }
   0xa   :  { %v988_v28 = vld [vmem:[%s1390_s0 + $0x68] sm:$0xff]   ;;  %v989_v29 = vld [vmem:[%s1390_s0 + $0x30] sm:$0xff]   ;;  %v991_v31 = vld [vmem:[%s1390_s0 + $0x38] sm:$0xff]  }
   0xb   :  { %376 = vmatpush1.bf16.msra.mxu0 %v961_v6  ;;  %945 = vmatpush1.bf16.msra.mxu1 %v961_v6  ;;  %v990_v30 = vld [vmem:[%s1390_s0 + $0x70] sm:$0xff]   ;;  %v992_v32 = vld [vmem:[%s1390_s0 + $0x78] sm:$0xff]   ;;  %v759_v36 = vld [vmem:[%s1391_s2] sm:$0x3] }
   0xc   :  { %377 = vmatprep.subr.bf16.mxu0 %v962_v7  ;;  %938 = vmatprep.subr.bf16.mxu1 %v962_v7  ;;  %v1129_v38 = vrot.slane %v759_v36, %v763_v35  ;;  %v1131_v41 = vrot.slane %v759_v36, %v767_v37 }
   0xf   :  { %378 = vmatpush1.bf16.msra.mxu0 %v964_v8  ;;  %946 = vmatpush1.bf16.msra.mxu1 %v964_v8 }
  0x10   :  { %379 = vmatprep.subr.bf16.mxu0 %v965_v9  ;;  %939 = vmatprep.subr.bf16.mxu1 %v965_v9 }
  0x13   :  { %380 = vmatpush1.bf16.msra.mxu0 %v967_v10  ;;  %947 = vmatpush1.bf16.msra.mxu1 %v967_v10 }
  0x14   :  { %381 = vmatprep.subr.bf16.mxu0 %v968_v11  ;;  %940 = vmatprep.subr.bf16.mxu1 %v968_v11 }
  0x17   :  { %382 = vmatpush1.bf16.msra.mxu0 %v970_v12  ;;  %948 = vmatpush1.bf16.msra.mxu1 %v970_v12 }
  0x18   :  { %383 = vmatprep.subr.bf16.mxu0 %v971_v13  ;;  %941 = vmatprep.subr.bf16.mxu1 %v971_v13 }
  0x1b   :  { %384 = vmatpush1.bf16.msra.mxu0 %v973_v14  ;;  %949 = vmatpush1.bf16.msra.mxu1 %v973_v14 }
  0x1c   :  { %385 = vmatprep.subr.bf16.mxu0 %v974_v15  ;;  %942 = vmatprep.subr.bf16.mxu1 %v974_v15 }
  0x1f   :  { %386 = vmatpush1.bf16.msra.mxu0 %v976_v16  ;;  %950 = vmatpush1.bf16.msra.mxu1 %v976_v16 }
  0x22   :  { %404 = vmatmul.mubr.bf16.vlgmr.msra.gmra.mrb[0].mxu0 %v977_v17  ;;  %484 = vmatmul.mubr.bf16.vlgmr.msra.gmra.mrb[0].mxu1 %v978_v18 }
  0x23   :  { %413 = vmatprep.mubr.bf16.mxu0 %v993_v1  ;;  %493 = vmatprep.mubr.bf16.mxu1 %v993_v1 }
  0x2a   :  { %414 = vmatmul.mubr.bf16.gmra.mrb[4].mxu0 %v979_v19  ;;  %494 = vmatmul.mubr.bf16.gmra.mrb[4].mxu1 %v980_v20 }
  0x2b   :  { %423 = vmatprep.mubr.bf16.mxu0 %v993_v1  ;;  %503 = vmatprep.mubr.bf16.mxu1 %v993_v1 }
  0x32   :  { %424 = vmatmul.mubr.bf16.gmra.mrb[8].mxu0 %v981_v21  ;;  %504 = vmatmul.mubr.bf16.gmra.mrb[8].mxu1 %v982_v22 }
  0x33   :  { %433 = vmatprep.mubr.bf16.mxu0 %v993_v1  ;;  %513 = vmatprep.mubr.bf16.mxu1 %v993_v1 }
  0x3a   :  { %434 = vmatmul.mubr.bf16.gmra.mrb[12].mxu0 %v983_v23  ;;  %514 = vmatmul.mubr.bf16.gmra.mrb[12].mxu1 %v984_v24 }
  0x3b   :  { %443 = vmatprep.mubr.bf16.mxu0 %v993_v1  ;;  %523 = vmatprep.mubr.bf16.mxu1 %v993_v1 }
  0x42   :  { %444 = vmatmul.mubr.bf16.gmra.mrb[16].mxu0 %v985_v25  ;;  %524 = vmatmul.mubr.bf16.gmra.mrb[16].mxu1 %v986_v26 }
  0x43   :  { %453 = vmatprep.mubr.bf16.mxu0 %v993_v1  ;;  %533 = vmatprep.mubr.bf16.mxu1 %v993_v1 }
  0x4a   :  { %454 = vmatmul.mubr.bf16.gmra.mrb[20].mxu0 %v987_v27  ;;  %534 = vmatmul.mubr.bf16.gmra.mrb[20].mxu1 %v988_v28 }
  0x4b   :  { %463 = vmatprep.mubr.bf16.mxu0 %v993_v1  ;;  %543 = vmatprep.mubr.bf16.mxu1 %v993_v1 }
  0x52   :  { %464 = vmatmul.mubr.bf16.gmra.mrb[24].mxu0 %v989_v29  ;;  %544 = vmatmul.mubr.bf16.gmra.mrb[24].mxu1 %v990_v30 }
  0x53   :  { %473 = vmatprep.mubr.bf16.mxu0 %v993_v1  ;;  %553 = vmatprep.mubr.bf16.mxu1 %v993_v1 }
  0x5a   :  { %474 = vmatmul.mubr.bf16.gmra.mrb[28].mxu0 %v991_v31  ;;  %554 = vmatmul.mubr.bf16.gmra.mrb[28].mxu1 %v992_v32 }
  0xf5   :  { %v405_v39 = vpop.f32.mrb[0].mxu0  ;;  %v485_v40 = vpop.f32.mrb[0].mxu1 }
  0xf6   :  { %v407_v42 = vpop.f32.mrb[1].mxu0  ;;  %v487_v43 = vpop.f32.mrb[1].mxu1  ;;  %v771_v46 = vadd.f32 %v1129_v38, %v405_v39  ;;  %v803_v47 = vadd.f32 %v1129_v38, %v485_v40 }
  0xf7   :  { %v409_v44 = vpop.f32.mrb[2].mxu0  ;;  %v489_v45 = vpop.f32.mrb[2].mxu1  ;;  %v772_v50 = vadd.f32 %v1131_v41, %v407_v42  ;;  %v804_v51 = vadd.f32 %v1131_v41, %v487_v43 }
  0xf8   :  { %v411_v48 = vpop.f32.mrb[3].mxu0  ;;  %v491_v49 = vpop.f32.mrb[3].mxu1  ;;  %835 = vst [vmem:[%s1392_s3] sm:$0xff] %v771_v46  ;;  %867 = vst [vmem:[%s1392_s3 + $0x100] sm:$0xff] %v803_v47  ;;  %v773_v52 = vadd.f32 %v1129_v38, %v409_v44  ;;  %v805_v53 = vadd.f32 %v1129_v38, %v489_v45 }
  0xf9   :  { %836 = vst [vmem:[%s1392_s3 + $0x8] sm:$0xff] %v772_v50  ;;  %868 = vst [vmem:[%s1392_s3 + $0x108] sm:$0xff] %v804_v51  ;;  %v774_v54 = vadd.f32 %v1131_v41, %v411_v48  ;;  %v806_v55 = vadd.f32 %v1131_v41, %v491_v49 }
  0xfa   :  { %837 = vst [vmem:[%s1392_s3 + $0x10] sm:$0xff] %v773_v52  ;;  %869 = vst [vmem:[%s1392_s3 + $0x110] sm:$0xff] %v805_v53 }
  0xfb   :  { %838 = vst [vmem:[%s1392_s3 + $0x18] sm:$0xff] %v774_v54  ;;  %870 = vst [vmem:[%s1392_s3 + $0x118] sm:$0xff] %v806_v55 }
  0xfd   :  { %v415_v56 = vpop.f32.mrb[4].mxu0  ;;  %v495_v57 = vpop.f32.mrb[4].mxu1 }
  0xfe   :  { %v417_v58 = vpop.f32.mrb[5].mxu0  ;;  %v497_v59 = vpop.f32.mrb[5].mxu1  ;;  %v775_v62 = vadd.f32 %v1129_v38, %v415_v56  ;;  %v807_v63 = vadd.f32 %v1129_v38, %v495_v57 }
  0xff   :  { %v419_v60 = vpop.f32.mrb[6].mxu0  ;;  %v499_v61 = vpop.f32.mrb[6].mxu1  ;;  %v776_v2 = vadd.f32 %v1131_v41, %v417_v58  ;;  %v808_v3 = vadd.f32 %v1131_v41, %v497_v59 }
 0x100   :  { %v421_v0 = vpop.f32.mrb[7].mxu0  ;;  %v501_v1 = vpop.f32.mrb[7].mxu1  ;;  %839 = vst [vmem:[%s1392_s3 + $0x20] sm:$0xff] %v775_v62  ;;  %871 = vst [vmem:[%s1392_s3 + $0x120] sm:$0xff] %v807_v63  ;;  %v777_v4 = vadd.f32 %v1129_v38, %v419_v60  ;;  %v809_v5 = vadd.f32 %v1129_v38, %v499_v61 }
 0x101   :  { %840 = vst [vmem:[%s1392_s3 + $0x28] sm:$0xff] %v776_v2  ;;  %872 = vst [vmem:[%s1392_s3 + $0x128] sm:$0xff] %v808_v3  ;;  %v778_v6 = vadd.f32 %v1131_v41, %v421_v0  ;;  %v810_v7 = vadd.f32 %v1131_v41, %v501_v1 }
 0x102   :  { %841 = vst [vmem:[%s1392_s3 + $0x30] sm:$0xff] %v777_v4  ;;  %873 = vst [vmem:[%s1392_s3 + $0x130] sm:$0xff] %v809_v5 }
 0x103   :  { %842 = vst [vmem:[%s1392_s3 + $0x38] sm:$0xff] %v778_v6  ;;  %874 = vst [vmem:[%s1392_s3 + $0x138] sm:$0xff] %v810_v7 }
 0x105   :  { %v425_v8 = vpop.f32.mrb[8].mxu0  ;;  %v505_v9 = vpop.f32.mrb[8].mxu1 }
 0x106   :  { %v427_v10 = vpop.f32.mrb[9].mxu0  ;;  %v507_v11 = vpop.f32.mrb[9].mxu1  ;;  %v779_v14 = vadd.f32 %v1129_v38, %v425_v8  ;;  %v811_v15 = vadd.f32 %v1129_v38, %v505_v9 }
 0x107   :  { %v429_v12 = vpop.f32.mrb[10].mxu0  ;;  %v509_v13 = vpop.f32.mrb[10].mxu1  ;;  %v780_v18 = vadd.f32 %v1131_v41, %v427_v10  ;;  %v812_v19 = vadd.f32 %v1131_v41, %v507_v11 }
 0x108   :  { %v431_v16 = vpop.f32.mrb[11].mxu0  ;;  %v511_v17 = vpop.f32.mrb[11].mxu1  ;;  %843 = vst [vmem:[%s1392_s3 + $0x40] sm:$0xff] %v779_v14  ;;  %875 = vst [vmem:[%s1392_s3 + $0x140] sm:$0xff] %v811_v15  ;;  %v781_v20 = vadd.f32 %v1129_v38, %v429_v12  ;;  %v813_v21 = vadd.f32 %v1129_v38, %v509_v13 }
 0x109   :  { %844 = vst [vmem:[%s1392_s3 + $0x48] sm:$0xff] %v780_v18  ;;  %876 = vst [vmem:[%s1392_s3 + $0x148] sm:$0xff] %v812_v19  ;;  %v782_v22 = vadd.f32 %v1131_v41, %v431_v16  ;;  %v814_v23 = vadd.f32 %v1131_v41, %v511_v17 }
 0x10a   :  { %845 = vst [vmem:[%s1392_s3 + $0x50] sm:$0xff] %v781_v20  ;;  %877 = vst [vmem:[%s1392_s3 + $0x150] sm:$0xff] %v813_v21 }
 0x10b   :  { %846 = vst [vmem:[%s1392_s3 + $0x58] sm:$0xff] %v782_v22  ;;  %878 = vst [vmem:[%s1392_s3 + $0x158] sm:$0xff] %v814_v23 }
 0x10d   :  { %v435_v24 = vpop.f32.mrb[12].mxu0  ;;  %v515_v25 = vpop.f32.mrb[12].mxu1 }
 0x10e   :  { %v437_v26 = vpop.f32.mrb[13].mxu0  ;;  %v517_v27 = vpop.f32.mrb[13].mxu1  ;;  %v783_v30 = vadd.f32 %v1129_v38, %v435_v24  ;;  %v815_v31 = vadd.f32 %v1129_v38, %v515_v25 }
 0x10f   :  { %v439_v28 = vpop.f32.mrb[14].mxu0  ;;  %v519_v29 = vpop.f32.mrb[14].mxu1  ;;  %v784_v34 = vadd.f32 %v1131_v41, %v437_v26  ;;  %v816_v35 = vadd.f32 %v1131_v41, %v517_v27 }
 0x110   :  { %v441_v32 = vpop.f32.mrb[15].mxu0  ;;  %v521_v33 = vpop.f32.mrb[15].mxu1  ;;  %847 = vst [vmem:[%s1392_s3 + $0x60] sm:$0xff] %v783_v30  ;;  %879 = vst [vmem:[%s1392_s3 + $0x160] sm:$0xff] %v815_v31  ;;  %v785_v36 = vadd.f32 %v1129_v38, %v439_v28  ;;  %v817_v37 = vadd.f32 %v1129_v38, %v519_v29 }
 0x111   :  { %848 = vst [vmem:[%s1392_s3 + $0x68] sm:$0xff] %v784_v34  ;;  %880 = vst [vmem:[%s1392_s3 + $0x168] sm:$0xff] %v816_v35  ;;  %v786_v39 = vadd.f32 %v1131_v41, %v441_v32  ;;  %v818_v40 = vadd.f32 %v1131_v41, %v521_v33 }
 0x112   :  { %849 = vst [vmem:[%s1392_s3 + $0x70] sm:$0xff] %v785_v36  ;;  %881 = vst [vmem:[%s1392_s3 + $0x170] sm:$0xff] %v817_v37 }
 0x113   :  { %850 = vst [vmem:[%s1392_s3 + $0x78] sm:$0xff] %v786_v39  ;;  %882 = vst [vmem:[%s1392_s3 + $0x178] sm:$0xff] %v818_v40 }
 0x115   :  { %v445_v42 = vpop.f32.mrb[16].mxu0  ;;  %v525_v43 = vpop.f32.mrb[16].mxu1 }
 0x116   :  { %v447_v44 = vpop.f32.mrb[17].mxu0  ;;  %v527_v45 = vpop.f32.mrb[17].mxu1  ;;  %v787_v48 = vadd.f32 %v1129_v38, %v445_v42  ;;  %v819_v49 = vadd.f32 %v1129_v38, %v525_v43 }
 0x117   :  { %v449_v46 = vpop.f32.mrb[18].mxu0  ;;  %v529_v47 = vpop.f32.mrb[18].mxu1  ;;  %v788_v52 = vadd.f32 %v1131_v41, %v447_v44  ;;  %v820_v53 = vadd.f32 %v1131_v41, %v527_v45 }
 0x118   :  { %v451_v50 = vpop.f32.mrb[19].mxu0  ;;  %v531_v51 = vpop.f32.mrb[19].mxu1  ;;  %851 = vst [vmem:[%s1392_s3 + $0x80] sm:$0xff] %v787_v48  ;;  %883 = vst [vmem:[%s1392_s3 + $0x180] sm:$0xff] %v819_v49  ;;  %v789_v54 = vadd.f32 %v1129_v38, %v449_v46  ;;  %v821_v55 = vadd.f32 %v1129_v38, %v529_v47 }
 0x119   :  { %852 = vst [vmem:[%s1392_s3 + $0x88] sm:$0xff] %v788_v52  ;;  %884 = vst [vmem:[%s1392_s3 + $0x188] sm:$0xff] %v820_v53  ;;  %v790_v56 = vadd.f32 %v1131_v41, %v451_v50  ;;  %v822_v57 = vadd.f32 %v1131_v41, %v531_v51 }
 0x11a   :  { %853 = vst [vmem:[%s1392_s3 + $0x90] sm:$0xff] %v789_v54  ;;  %885 = vst [vmem:[%s1392_s3 + $0x190] sm:$0xff] %v821_v55 }
 0x11b   :  { %854 = vst [vmem:[%s1392_s3 + $0x98] sm:$0xff] %v790_v56  ;;  %886 = vst [vmem:[%s1392_s3 + $0x198] sm:$0xff] %v822_v57 }
 0x11d   :  { %v455_v58 = vpop.f32.mrb[20].mxu0  ;;  %v535_v59 = vpop.f32.mrb[20].mxu1 }
 0x11e   :  { %v457_v60 = vpop.f32.mrb[21].mxu0  ;;  %v537_v61 = vpop.f32.mrb[21].mxu1  ;;  %v791_v0 = vadd.f32 %v1129_v38, %v455_v58  ;;  %v823_v1 = vadd.f32 %v1129_v38, %v535_v59 }
 0x11f   :  { %v459_v62 = vpop.f32.mrb[22].mxu0  ;;  %v539_v63 = vpop.f32.mrb[22].mxu1  ;;  %v792_v4 = vadd.f32 %v1131_v41, %v457_v60  ;;  %v824_v5 = vadd.f32 %v1131_v41, %v537_v61 }
 0x120   :  { %v461_v2 = vpop.f32.mrb[23].mxu0  ;;  %v541_v3 = vpop.f32.mrb[23].mxu1  ;;  %855 = vst [vmem:[%s1392_s3 + $0xa0] sm:$0xff] %v791_v0  ;;  %887 = vst [vmem:[%s1392_s3 + $0x1a0] sm:$0xff] %v823_v1  ;;  %v793_v6 = vadd.f32 %v1129_v38, %v459_v62  ;;  %v825_v7 = vadd.f32 %v1129_v38, %v539_v63 }
 0x121   :  { %856 = vst [vmem:[%s1392_s3 + $0xa8] sm:$0xff] %v792_v4  ;;  %888 = vst [vmem:[%s1392_s3 + $0x1a8] sm:$0xff] %v824_v5  ;;  %v794_v8 = vadd.f32 %v1131_v41, %v461_v2  ;;  %v826_v9 = vadd.f32 %v1131_v41, %v541_v3 }
 0x122   :  { %857 = vst [vmem:[%s1392_s3 + $0xb0] sm:$0xff] %v793_v6  ;;  %889 = vst [vmem:[%s1392_s3 + $0x1b0] sm:$0xff] %v825_v7 }
 0x123   :  { %858 = vst [vmem:[%s1392_s3 + $0xb8] sm:$0xff] %v794_v8  ;;  %890 = vst [vmem:[%s1392_s3 + $0x1b8] sm:$0xff] %v826_v9 }
 0x125   :  { %v465_v10 = vpop.f32.mrb[24].mxu0  ;;  %v545_v11 = vpop.f32.mrb[24].mxu1 }
 0x126   :  { %v467_v12 = vpop.f32.mrb[25].mxu0  ;;  %v547_v13 = vpop.f32.mrb[25].mxu1  ;;  %v795_v16 = vadd.f32 %v1129_v38, %v465_v10  ;;  %v827_v17 = vadd.f32 %v1129_v38, %v545_v11 }
 0x127   :  { %v469_v14 = vpop.f32.mrb[26].mxu0  ;;  %v549_v15 = vpop.f32.mrb[26].mxu1  ;;  %v796_v20 = vadd.f32 %v1131_v41, %v467_v12  ;;  %v828_v21 = vadd.f32 %v1131_v41, %v547_v13 }
 0x128   :  { %v471_v18 = vpop.f32.mrb[27].mxu0  ;;  %v551_v19 = vpop.f32.mrb[27].mxu1  ;;  %859 = vst [vmem:[%s1392_s3 + $0xc0] sm:$0xff] %v795_v16  ;;  %891 = vst [vmem:[%s1392_s3 + $0x1c0] sm:$0xff] %v827_v17  ;;  %v797_v22 = vadd.f32 %v1129_v38, %v469_v14  ;;  %v829_v23 = vadd.f32 %v1129_v38, %v549_v15 }
 0x129   :  { %860 = vst [vmem:[%s1392_s3 + $0xc8] sm:$0xff] %v796_v20  ;;  %892 = vst [vmem:[%s1392_s3 + $0x1c8] sm:$0xff] %v828_v21  ;;  %v798_v24 = vadd.f32 %v1131_v41, %v471_v18  ;;  %v830_v25 = vadd.f32 %v1131_v41, %v551_v19 }
 0x12a   :  { %861 = vst [vmem:[%s1392_s3 + $0xd0] sm:$0xff] %v797_v22  ;;  %893 = vst [vmem:[%s1392_s3 + $0x1d0] sm:$0xff] %v829_v23 }
 0x12b   :  { %862 = vst [vmem:[%s1392_s3 + $0xd8] sm:$0xff] %v798_v24  ;;  %894 = vst [vmem:[%s1392_s3 + $0x1d8] sm:$0xff] %v830_v25 }
 0x12d   :  { %v475_v26 = vpop.f32.mrb[28].mxu0  ;;  %v555_v27 = vpop.f32.mrb[28].mxu1 }
 0x12e   :  { %v477_v28 = vpop.f32.mrb[29].mxu0  ;;  %v557_v29 = vpop.f32.mrb[29].mxu1  ;;  %v799_v32 = vadd.f32 %v1129_v38, %v475_v26  ;;  %v831_v33 = vadd.f32 %v1129_v38, %v555_v27 }
 0x12f   :  { %v479_v30 = vpop.f32.mrb[30].mxu0  ;;  %v559_v31 = vpop.f32.mrb[30].mxu1  ;;  %v800_v36 = vadd.f32 %v1131_v41, %v477_v28  ;;  %v832_v37 = vadd.f32 %v1131_v41, %v557_v29 }
 0x130   :  { %v481_v34 = vpop.f32.mrb[31].mxu0  ;;  %v561_v35 = vpop.f32.mrb[31].mxu1  ;;  %863 = vst [vmem:[%s1392_s3 + $0xe0] sm:$0xff] %v799_v32  ;;  %895 = vst [vmem:[%s1392_s3 + $0x1e0] sm:$0xff] %v831_v33  ;;  %v801_v39 = vadd.f32 %v1129_v38, %v479_v30  ;;  %v833_v40 = vadd.f32 %v1129_v38, %v559_v31 }
 0x131   :  { %864 = vst [vmem:[%s1392_s3 + $0xe8] sm:$0xff] %v800_v36  ;;  %896 = vst [vmem:[%s1392_s3 + $0x1e8] sm:$0xff] %v832_v37  ;;  %v802_v42 = vadd.f32 %v1131_v41, %v481_v34  ;;  %v834_v43 = vadd.f32 %v1131_v41, %v561_v35 }
 0x132   :  { %865 = vst [vmem:[%s1392_s3 + $0xf0] sm:$0xff] %v801_v39  ;;  %897 = vst [vmem:[%s1392_s3 + $0x1f0] sm:$0xff] %v833_v40 }
 0x133   :  { %866 = vst [vmem:[%s1392_s3 + $0xf8] sm:$0xff] %v802_v42  ;;  %898 = vst [vmem:[%s1392_s3 + $0x1f8] sm:$0xff] %v834_v43 }

</bundles_post_ra>
